<compile_context>
chip_gen: v7x
topology: tpu7x:2x2x1
jax: 0.10.0
libtpu: 0.0.40
codegen_flags: <defaults>
</compile_context>

<pallas_src>
import functools
import math

import jax
import jax.numpy as jnp
from jax import lax
from jax.experimental import pallas as pl
from jax.experimental.pallas import tpu as pltpu


# ----------------------------------------------------------------------------
# Kernels
# ----------------------------------------------------------------------------
def _ln_kernel(x_ref, alpha_ref, bias_ref, o_ref, *, eps: float):
    """Generic path: one logical row per sublane row, reduce over the lane axis."""
    x = x_ref[...].astype(jnp.float32)                       # (T, D)
    d = x.shape[-1]
    inv_ddof = (1.0 / (d - 1)) if d > 1 else float("nan")    # torch unbiased std

    mean = jnp.mean(x, axis=-1, keepdims=True)                # (T, 1)
    centered = x - mean
    var = jnp.sum(centered * centered, axis=-1, keepdims=True) * inv_ddof
    inv = 1.0 / (jnp.sqrt(var) + eps)                         # exact, per-row only
    o_ref[...] = (centered * inv * alpha_ref[...] + bias_ref[...]).astype(o_ref.dtype)


def _ln_kernel_packed(x_ref, seg_ref, segt_ref, segt_alpha_ref, bias_ref, o_ref,
                      *, eps: float, d_model: int, k: int):
    """Lane-packed path: k logical rows of width d_model share one lane-dense row.

    Per-segment reductions / broadcasts are expressed as matmuls against a 0/1
    segment matrix (built once in the wrapper), so they run on the otherwise
    idle MXU and all elementwise work stays lane-dense / unmasked.
    """
    x = x_ref[...].astype(jnp.float32)                        # (T, W), W = k*d_model
    inv_d = 1.0 / d_model
    inv_ddof = (1.0 / (d_model - 1)) if d_model > 1 else float("nan")

    seg = seg_ref[...]                                        # (W, kp)  0/1
    segt = segt_ref[...]                                      # (kp, W)  0/1
    segt_alpha = segt_alpha_ref[...]                          # (kp, W)  segT * alpha

    hi = lax.Precision.HIGHEST                                # keep f32 accuracy on MXU
    mean = jnp.dot(x, seg, preferred_element_type=jnp.float32,
                   precision=hi) * inv_d                      # (T, kp)
    mean_b = jnp.dot(mean, segt, preferred_element_type=jnp.float32,
                     precision=hi)                            # (T, W)
    centered = x - mean_b
    var = jnp.dot(centered * centered, seg, preferred_element_type=jnp.float32,
                  precision=hi) * inv_ddof                    # (T, kp)

    # Exact divide on the tiny (T, kp) column; zero padded segment columns so
    # they can never contaminate the broadcast (even if eps were 0).
    col = lax.broadcasted_iota(jnp.int32, var.shape, 1)
    inv = jnp.where(col < k, 1.0 / (jnp.sqrt(var) + eps), 0.0)

    inv_alpha_b = jnp.dot(inv, segt_alpha, preferred_element_type=jnp.float32,
                          precision=hi)                       # (T, W) = inv * alpha
    o_ref[...] = (centered * inv_alpha_b + bias_ref[...]).astype(o_ref.dtype)


# ----------------------------------------------------------------------------
# Sizing helpers
# ----------------------------------------------------------------------------
def _num_tensorcores():
    """Best-effort TensorCore count of the local device (1 on v5e/v6e, 2 on v7x)."""
    try:
        return max(1, int(getattr(jax.devices()[0], "num_cores", 1) or 1))
    except Exception:
        return 1


def _vmem_limit_bytes():
    """Generation-aware scoped-VMEM limit (same number used for tile sizing)."""
    try:
        cap = int(pltpu.get_tpu_info().vmem_capacity_bytes)
    except Exception:
        cap = None
    if cap is None or cap <= 0:
        return 48 * 1024 * 1024            # safe on every generation
    if cap <= 64 * 1024 * 1024:            # v7x: 64 MiB physical per TensorCore
        return 48 * 1024 * 1024
    return 96 * 1024 * 1024                # v5e / v6e: 128 MiB physical


def _choose_row_tile(n_rows, width, itemsize, vmem_budget, *, max_tile=8192,
                     num_cores=1):
    """Largest aligned row tile whose estimated VMEM footprint fits the budget.

    Footprint estimate: double-buffered in + out blocks in the input dtype plus
    ~4 live f32 temporaries inside the kernel body.
    """
    align = 8 if itemsize >= 4 else (16 if itemsize == 2 else 32)
    per_row = width * (4 * itemsize + 4 * 4)
    t = min(max_tile, max(align, vmem_budget // per_row))
    t = max(align, (t // align) * align)
    if t >= n_rows:
        if num_cores > 1 and n_rows >= 2 * num_cores * align:
            # Multi-TensorCore chip (v7x): split so both cores get a block of
            # the 'parallel' row axis.  Single-TC chips keep one full block.
            per_core = -(-n_rows // num_cores)
            t = -(-per_core // align) * align
        else:
            t = n_rows                      # block == full dim (always allowed)
    return t


def _packing_factor(d_model, rows, max_width=512):
    """k logical rows packed into one lane-dense row of width k*d_model."""
    if d_model <= 1 or d_model % 128 == 0:
        return 1
    k = 128 // math.gcd(d_model, 128)       # lcm(d_model, 128) // d_model
    width = k * d_model
    if k > 1 and width <= max_width and rows % k == 0 and rows // k > 0:
        return k
    return 1


# ----------------------------------------------------------------------------
# Wrapper
# ----------------------------------------------------------------------------
def layer_normalization(x, alpha, bias, eps=1e-6, *, row_tile=None,
                        vmem_limit_bytes=None):
    """x: (..., d_model); alpha, bias: (d_model,). Matches the torch module."""
    orig_shape = x.shape
    d_model = orig_shape[-1]
    x2d = x.reshape(-1, d_model)
    rows = x2d.shape[0]

    if vmem_limit_bytes is None:
        vmem_limit_bytes = _vmem_limit_bytes()
    vmem_budget = (3 * vmem_limit_bytes) // 4     # headroom below the compiler cap
    num_cores = _num_tensorcores()

    alpha_f32 = jnp.asarray(alpha, jnp.float32).reshape(1, d_model)
    bias_f32 = jnp.asarray(bias, jnp.float32).reshape(1, d_model)

    k = _packing_factor(d_model, rows)

    if k > 1:
        # Lane-packed path: fold k rows into a lane-dense row (contiguous
        # reshape, no copy); width is a multiple of 128 so stores are unmasked.
        width = k * d_model
        n_rows = rows // k
        x_in = x2d.reshape(n_rows, width)
        kp = ((k + 7) // 8) * 8

        lane_seg = jnp.arange(width, dtype=jnp.int32) // d_model
        seg = (lane_seg[:, None] ==
               jnp.arange(kp, dtype=jnp.int32)[None, :]).astype(jnp.float32)   # (W, kp)
        segt = seg.T                                                            # (kp, W)
        alpha_p = jnp.tile(alpha_f32, (1, k))                                   # (1, W)
        bias_p = jnp.tile(bias_f32, (1, k))                                     # (1, W)
        segt_alpha = segt * alpha_p                                             # (kp, W)

        kernel = functools.partial(_ln_kernel_packed, eps=eps,
                                   d_model=d_model, k=k)
        extra_inputs = (seg, segt, segt_alpha, bias_p)
        extra_specs = [
            pl.BlockSpec((width, kp), lambda i: (0, 0)),
            pl.BlockSpec((kp, width), lambda i: (0, 0)),
            pl.BlockSpec((kp, width), lambda i: (0, 0)),
            pl.BlockSpec((1, width), lambda i: (0, 0)),
        ]
    else:
        width = d_model
        n_rows = rows
        x_in = x2d
        kernel = functools.partial(_ln_kernel, eps=eps)
        extra_inputs = (alpha_f32, bias_f32)
        extra_specs = [
            pl.BlockSpec((1, width), lambda i: (0, 0)),
            pl.BlockSpec((1, width), lambda i: (0, 0)),
        ]

    if row_tile is None:
        row_tile = _choose_row_tile(n_rows, width, x.dtype.itemsize,
                                    vmem_budget, num_cores=num_cores)
    row_tile = max(1, min(row_tile, n_rows))

    # Ragged last block is fine: the math is per-row, garbage rows in the padded
    # tail never contaminate valid rows and OOB writes are discarded.
    grid = (pl.cdiv(n_rows, row_tile),)

    out = pl.pallas_call(
        kernel,
        out_shape=jax.ShapeDtypeStruct((n_rows, width), x.dtype),
        grid_spec=pltpu.PrefetchScalarGridSpec(
            num_scalar_prefetch=0,
            grid=grid,
            in_specs=[pl.BlockSpec((row_tile, width), lambda i: (i, 0))]
                     + extra_specs,
            out_specs=pl.BlockSpec((row_tile, width), lambda i: (i, 0)),
        ),
        compiler_params=pltpu.CompilerParams(
            dimension_semantics=("parallel",),
            vmem_limit_bytes=vmem_limit_bytes,
        ),
    )(x_in, *extra_inputs)

    return out.reshape(orig_shape)


# ----------------------------------------------------------------------------
# Reference + self-test
# ----------------------------------------------------------------------------
def _reference(x, alpha, bias, eps):
    d = x.shape[-1]
    mean = jnp.mean(x, axis=-1, keepdims=True)
    std = jnp.sqrt(jnp.sum((x - mean) ** 2, axis=-1, keepdims=True) / (d - 1))
    return alpha * (x - mean) / (std + eps) + bias


if __name__ == "__main__":
    eps = 1e-6
    key = jax.random.PRNGKey(0)

    # d_model=32  -> lane-packed path (width 128)
    # d_model=96  -> lane-packed path via lcm (width 384)
    # d_model=128 -> generic path (already lane-dense)
    for (batch, seq, d_model) in [(2, 8, 32), (2, 8, 96), (2, 8, 128)]:
        kx, ka, kb, key = jax.random.split(key, 4)
        x = jax.random.normal(kx, (batch, seq, d_model), dtype=jnp.float32)
        alpha = 1.0 + 0.1 * jax.random.normal(ka, (d_model,), dtype=jnp.float32)
        bias = 0.1 * jax.random.normal(kb, (d_model,), dtype=jnp.float32)

        out = layer_normalization(x, alpha, bias, eps)
        out = jax.block_until_ready(out)

        ref = _reference(x, alpha, bias, eps)
        err = float(jnp.max(jnp.abs(out - ref)))
        assert jnp.allclose(out, ref, atol=1e-4, rtol=1e-4), (
            f"mismatch vs reference for d_model={d_model}: max abs err {err:.3e}")

    print("KERNEL_OK")
</pallas_src>

<mosaic_0001>
module attributes {stable_mosaic.version = 11 : i64} {
  func.func @_ln_kernel_packed(%arg0: i32, %arg1: memref<4x128xf32, #tpu.memory_space<vmem>>, %arg2: memref<128x8xf32, #tpu.memory_space<vmem>>, %arg3: memref<8x128xf32, #tpu.memory_space<vmem>>, %arg4: memref<8x128xf32, #tpu.memory_space<vmem>>, %arg5: memref<1x128xf32, #tpu.memory_space<vmem>>, %arg6: memref<4x128xf32, #tpu.memory_space<vmem>>) attributes {dimension_semantics = [#tpu.dimension_semantics<parallel>], iteration_bounds = array<i64: 1>, scalar_prefetch = 0 : i64, scratch_operands = 0 : i64, tpu.core_type = #tpu.core_type<tc>, window_params = [{transform_indices = @transform_0, window_bounds = array<i64: 4, 128>}, {pipeline_mode = #tpu.pipeline_mode<synchronous>, transform_indices = @transform_1, window_bounds = array<i64: 128, 8>}, {pipeline_mode = #tpu.pipeline_mode<synchronous>, transform_indices = @transform_2, window_bounds = array<i64: 8, 128>}, {pipeline_mode = #tpu.pipeline_mode<synchronous>, transform_indices = @transform_3, window_bounds = array<i64: 8, 128>}, {pipeline_mode = #tpu.pipeline_mode<synchronous>, transform_indices = @transform_4, window_bounds = array<i64: 1, 128>}, {transform_indices = @transform_5, window_bounds = array<i64: 4, 128>}]} {
    %c0 = arith.constant 0 : index
    %c0_0 = arith.constant 0 : index
    %0 = vector.load %arg1[%c0, %c0_0] : memref<4x128xf32, #tpu.memory_space<vmem>>, vector<4x128xf32>
    %c0_1 = arith.constant 0 : index
    %c0_2 = arith.constant 0 : index
    %1 = vector.load %arg2[%c0_1, %c0_2] : memref<128x8xf32, #tpu.memory_space<vmem>>, vector<128x8xf32>
    %c0_3 = arith.constant 0 : index
    %c0_4 = arith.constant 0 : index
    %2 = vector.load %arg3[%c0_3, %c0_4] : memref<8x128xf32, #tpu.memory_space<vmem>>, vector<8x128xf32>
    %c0_5 = arith.constant 0 : index
    %c0_6 = arith.constant 0 : index
    %3 = vector.load %arg4[%c0_5, %c0_6] : memref<8x128xf32, #tpu.memory_space<vmem>>, vector<8x128xf32>
    %cst = arith.constant dense<0.000000e+00> : vector<4x8xf32>
    %4 = tpu.matmul %0, %1, %cst {dimension_numbers = #tpu.dot_dimension_numbers<[1], [0], [0], [1], [0, 0, 1, 1], [], []>, precision = #tpu.contract_precision<fp32>} : vector<4x128xf32>, vector<128x8xf32>, vector<4x8xf32> -> vector<4x8xf32>
    %cst_7 = arith.constant 3.125000e-02 : f32
    %5 = vector.broadcast %cst_7 : f32 to vector<4x8xf32>
    %6 = arith.mulf %4, %5 : vector<4x8xf32>
    %cst_8 = arith.constant dense<0.000000e+00> : vector<4x128xf32>
    %7 = tpu.matmul %6, %2, %cst_8 {dimension_numbers = #tpu.dot_dimension_numbers<[1], [0], [0], [1], [0, 0, 1, 1], [], []>, precision = #tpu.contract_precision<fp32>} : vector<4x8xf32>, vector<8x128xf32>, vector<4x128xf32> -> vector<4x128xf32>
    %8 = arith.subf %0, %7 : vector<4x128xf32>
    %9 = arith.mulf %8, %8 : vector<4x128xf32>
    %cst_9 = arith.constant dense<0.000000e+00> : vector<4x8xf32>
    %10 = tpu.matmul %9, %1, %cst_9 {dimension_numbers = #tpu.dot_dimension_numbers<[1], [0], [0], [1], [0, 0, 1, 1], [], []>, precision = #tpu.contract_precision<fp32>} : vector<4x128xf32>, vector<128x8xf32>, vector<4x8xf32> -> vector<4x8xf32>
    %cst_10 = arith.constant 0.0322580636 : f32
    %11 = vector.broadcast %cst_10 : f32 to vector<4x8xf32>
    %12 = arith.mulf %10, %11 : vector<4x8xf32>
    %13 = tpu.iota {dimensions = array<i32: 1>} : vector<4x8xi32>
    %c4_i32 = arith.constant 4 : i32
    %14 = vector.broadcast %c4_i32 : i32 to vector<4x8xi32>
    %15 = arith.cmpi slt, %13, %14 : vector<4x8xi32>
    %16 = math.sqrt %12 : vector<4x8xf32>
    %cst_11 = arith.constant 9.99999997E-7 : f32
    %17 = vector.broadcast %cst_11 : f32 to vector<4x8xf32>
    %18 = arith.addf %16, %17 : vector<4x8xf32>
    %cst_12 = arith.constant 1.000000e+00 : f32
    %19 = vector.broadcast %cst_12 : f32 to vector<4x8xf32>
    %20 = arith.divf %19, %18 : vector<4x8xf32>
    %cst_13 = arith.constant 0.000000e+00 : f32
    %21 = vector.broadcast %cst_13 : f32 to vector<4x8xf32>
    %22 = arith.select %15, %20, %21 : vector<4x8xi1>, vector<4x8xf32>
    %cst_14 = arith.constant dense<0.000000e+00> : vector<4x128xf32>
    %23 = tpu.matmul %22, %3, %cst_14 {dimension_numbers = #tpu.dot_dimension_numbers<[1], [0], [0], [1], [0, 0, 1, 1], [], []>, precision = #tpu.contract_precision<fp32>} : vector<4x8xf32>, vector<8x128xf32>, vector<4x128xf32> -> vector<4x128xf32>
    %24 = arith.mulf %8, %23 : vector<4x128xf32>
    %c0_15 = arith.constant 0 : index
    %c0_16 = arith.constant 0 : index
    %25 = vector.load %arg5[%c0_15, %c0_16] : memref<1x128xf32, #tpu.memory_space<vmem>>, vector<1x128xf32>
    %26 = vector.broadcast %25 : vector<1x128xf32> to vector<4x128xf32>
    %27 = arith.addf %24, %26 : vector<4x128xf32>
    %c0_17 = arith.constant 0 : index
    %c0_18 = arith.constant 0 : index
    %28 = vector.load %arg6[%c0_17, %c0_18] : memref<4x128xf32, #tpu.memory_space<vmem>>, vector<4x128xf32>
    tpu.vector_store %arg6[%c0_17, %c0_18], %27 {strides = array<i32>} : memref<4x128xf32, #tpu.memory_space<vmem>>, vector<4x128xf32>,
    return
  }
  func.func @transform_0(%arg0: i32) -> (i32, i32) {
    %c0_i32 = arith.constant 0 : i32
    %c0_i32_0 = arith.constant 0 : i32
    return %arg0, %c0_i32 : i32, i32
  }
  func.func @transform_1(%arg0: i32) -> (i32, i32) {
    %c0_i32 = arith.constant 0 : i32
    %c0_i32_0 = arith.constant 0 : i32
    %c0_i32_1 = arith.constant 0 : i32
    return %c0_i32, %c0_i32_0 : i32, i32
  }
  func.func @transform_2(%arg0: i32) -> (i32, i32) {
    %c0_i32 = arith.constant 0 : i32
    %c0_i32_0 = arith.constant 0 : i32
    %c0_i32_1 = arith.constant 0 : i32
    return %c0_i32, %c0_i32_0 : i32, i32
  }
  func.func @transform_3(%arg0: i32) -> (i32, i32) {
    %c0_i32 = arith.constant 0 : i32
    %c0_i32_0 = arith.constant 0 : i32
    %c0_i32_1 = arith.constant 0 : i32
    return %c0_i32, %c0_i32_0 : i32, i32
  }
  func.func @transform_4(%arg0: i32) -> (i32, i32) {
    %c0_i32 = arith.constant 0 : i32
    %c0_i32_0 = arith.constant 0 : i32
    %c0_i32_1 = arith.constant 0 : i32
    return %c0_i32, %c0_i32_0 : i32, i32
  }
  func.func @transform_5(%arg0: i32) -> (i32, i32) {
    %c0_i32 = arith.constant 0 : i32
    %c0_i32_0 = arith.constant 0 : i32
    return %arg0, %c0_i32 : i32, i32
  }
}

</mosaic_0001>

<bundles_post_ra>
// kernel: tpu_custom_call.1
= control target key start
LH: loop header
LB: loop body
LE: loop exit
PB: predicated region body
PF: predicated region fallthrough
CT: control target
= control target key end

     0   :  { %v3332_v3 = vmov 0.0|0.0   ;;  %vm3333_vm0 = vmmov 0   ;;  %v3334_v8 = vmov 0.0   ;;  %s3867_s0 = inlined_call_operand.vmem [shape: f32[4,128], index: 0, kind: input, shape index: {}]   ;;  %s3868_s1 = inlined_call_operand.vmem [shape: f32[128,8], index: 1, kind: input, shape index: {}]   ;;  %s3869_s2 = inlined_call_operand.vmem [shape: f32[8,128], index: 2, kind: input, shape index: {}]   ;;  %s3870_s3 = inlined_call_operand.vmem [shape: f32[8,128], index: 3, kind: input, shape index: {}]   ;;  %s3871_s4 = inlined_call_operand.vmem [shape: f32[1,128], index: 4, kind: input, shape index: {}]   ;;  %s3872_s5 = inlined_call_operand.hbm [shape: f32[4,128], index: 5, kind: output, shape index: {}]  }
   0x1   :  { %v22_v0 = vld [vmem:[%s3868_s1] sm:$0xff]  ;;  %v23_v1 = vld [vmem:[%s3868_s1 + $0x8] sm:$0xff]  ;;  %v24_v2 = vld [vmem:[%s3868_s1 + $0x10] sm:$0xff]  ;;  %2972 = vmatprep.subr.bf16.mxu0 %v3332_v3  ;;  %2524 = vmatprep.mubr.msk.f32.mxu0 %vm3333_vm0, %v3334_v8 }
   0x2   :  { %v41_v4 = vand.u32 4294901760, %v22_v0  ;;  %v44_v5 = vand.u32 4294901760, %v23_v1  ;;  %v25_v6 = vld [vmem:[%s3868_s1 + $0x18] sm:$0xff]  ;;  %v47_v7 = vand.u32 4294901760, %v24_v2  ;;  %v26_v10 = vld [vmem:[%s3868_s1 + $0x20] sm:$0xff]  ;;  %v27_v11 = vld [vmem:[%s3868_s1 + $0x28] sm:$0xff]  ;;  %2702 = vmatprep.subr.mxu1 %v3334_v8  ;;  %2704 = vmatprep.mubr.msk.f32.mxu1 %vm3333_vm0, %v3334_v8 }
   0x3   :  { %v50_v9 = vand.u32 4294901760, %v25_v6  ;;  %v53_v14 = vand.u32 4294901760, %v26_v10  ;;  %v56_v15 = vand.u32 4294901760, %v27_v11  ;;  %v28_v16 = vld [vmem:[%s3868_s1 + $0x30] sm:$0xff]  ;;  %v29_v17 = vld [vmem:[%s3868_s1 + $0x38] sm:$0xff] }
   0x4   :  { %v3390_v12 = vpack.c.bf16 %v44_v5, %v41_v4 }
   0x5   :  { %v3393_v13 = vpack.c.bf16 %v50_v9, %v47_v7 }
   0x6   :  { %2974 = vmatpush3.bf16.msra.mxu0 %v3390_v12 }
   0x7   :  { %2975 = vmatprep.subr.bf16.mxu0 %v3332_v3 }
   0x8   :  { %10 = vsyncpa [#allocation3], 0  ;;  %v3403_v18 = vpack.c.bf16 %v56_v15, %v53_v14  ;;  %v59_v19 = vand.u32 4294901760, %v28_v16  ;;  %v62_v20 = vand.u32 4294901760, %v29_v17  ;;  %v30_v21 = vld [vmem:[%s3868_s1 + $0x40] sm:$0xff]  ;;  %v31_v23 = vld [vmem:[%s3868_s1 + $0x48] sm:$0xff]  ;;  %v3441_v34 = vsub.f32 %v22_v0, %v41_v4 }
   0x9   :  { %v3411_v22 = vld [vmem:[%s3867_s0] sm:$0xf]  ;;  %v32_v24 = vld [vmem:[%s3868_s1 + $0x50] sm:$0xff]  ;;  %v33_v25 = vld [vmem:[%s3868_s1 + $0x58] sm:$0xff]  ;;  %v65_v27 = vand.u32 4294901760, %v30_v21  ;;  %v68_v33 = vand.u32 4294901760, %v31_v23  ;;  %v3443_v35 = vsub.f32 %v23_v1, %v44_v5  ;;  %v3450_v43 = vsub.f32 %v24_v2, %v47_v7 }
   0xa   :  { %2977 = vmatpush3.bf16.msra.mxu0 %v3393_v13  ;;  %v34_v26 = vld [vmem:[%s3868_s1 + $0x60] sm:$0xff]  ;;  %v35_v28 = vld [vmem:[%s3868_s1 + $0x68] sm:$0xff]  ;;  %v36_v29 = vld [vmem:[%s3868_s1 + $0x70] sm:$0xff]  ;;  %v3436_v31 = vand.u32 4294901760, %v3411_v22  ;;  %v3439_v32 = vpack.c.bf16 %v62_v20, %v59_v19  ;;  %v71_v36 = vand.u32 4294901760, %v32_v24  ;;  %v74_v37 = vand.u32 4294901760, %v33_v25 }
   0xb   :  { %2978 = vmatprep.subr.bf16.mxu0 %v3332_v3  ;;  %v37_v30 = vld [vmem:[%s3868_s1 + $0x78] sm:$0xff]  ;;  %v77_v38 = vand.u32 4294901760, %v34_v26  ;;  %v80_v39 = vand.u32 4294901760, %v35_v28  ;;  %v83_v40 = vand.u32 4294901760, %v36_v29  ;;  %v3452_v44 = vsub.f32 %v25_v6, %v50_v9  ;;  %s3335_s29 = smov [#allocation2]  }
   0xc   :  { %v86_v41 = vand.u32 4294901760, %v37_v30  ;;  %v3448_v42 = vsub.f32 %v3411_v22, %v3436_v31  ;;  %v3455_v45 = vpack.c.bf16 %v68_v33, %v65_v27  ;;  %v134_v46 = vand.u32 4294901760, %v3441_v34  ;;  %s2255_s30 = sshll.u32 %s3335_s29, 4  ;;  %s2256_s30 = int_to_ptr.vmem [resolvable:$true] %s2255_s30 }
   0xd   :  { %v141_v47 = vand.u32 4294901760, %v3443_v35  ;;  %v3459_v48 = vsub.f32 %v26_v10, %v53_v14  ;;  %v3462_v49 = vpack.c.bf16 %v74_v37, %v71_v36  ;;  %v3464_v50 = vpack.c.bf16 %v80_v39, %v77_v38  ;;  %s3308_s6 = scalar_lea.vmem %s2256_s30, 64  ;;  %p3313_p1 = scmp.lt.s32.totalorder %s2256_s30, %s2256_s30 }
   0xe   :  { %2980 = vmatpush3.bf16.msra.mxu0 %v3403_v18  ;;  %v3466_v51 = vpack.c.bf16 %v86_v41, %v83_v40  ;;  %v123_v52 = vand.u32 4294901760, %v3448_v42  ;;  %v148_v53 = vand.u32 4294901760, %v3450_v43  ;;  %v155_v54 = vand.u32 4294901760, %v3452_v44  ;;  %p3309_p0 = scmp.ne.s32.totalorder %s2256_s30, %s3308_s6  ;;  %p3314_p2 = scmp.lt.s32.totalorder %s3308_s6, %s3308_s6 }
   0xf   :  { %2981 = vmatprep.subr.bf16.mxu0 %v3332_v3  ;;  %v3471_v55 = vsub.f32 %v27_v11, %v56_v15  ;;  %v135_v56 = vsub.f32 %v3441_v34, %v134_v46  ;;  %v142_v57 = vsub.f32 %v3443_v35, %v141_v47  ;;  %v162_v58 = vand.u32 4294901760, %v3459_v48 }
  0x10   :  { %v3477_v59 = vsub.f32 %v28_v16, %v59_v19  ;;  %v3480_v60 = vsub.f32 %v29_v17, %v62_v20  ;;  %v3482_v61 = vsub.f32 %v30_v21, %v65_v27  ;;  %v3484_v62 = vsub.f32 %v31_v23, %v68_v33  ;;  %p3315_p3 = por %p3314_p2, %p3313_p1 }
  0x11   :  { %v3486_v63 = vsub.f32 %v32_v24, %v71_v36  ;;  %v3488_v0 = vsub.f32 %v33_v25, %v74_v37  ;;  %v3490_v1 = vsub.f32 %v34_v26, %v77_v38  ;;  %v3492_v2 = vsub.f32 %v35_v28, %v80_v39 }
  0x12   :  { %2983 = vmatpush3.bf16.msra.mxu0 %v3439_v32  ;;  %v3494_v4 = vsub.f32 %v36_v29, %v83_v40  ;;  %v124_v5 = vsub.f32 %v3448_v42, %v123_v52  ;;  %v149_v6 = vsub.f32 %v3450_v43, %v148_v53  ;;  %v169_v7 = vand.u32 4294901760, %v3471_v55  ;;  %p3316_p4 = pnand %p3315_p3, %p3309_p0 }
  0x13   :  { %2984 = vmatprep.subr.bf16.mxu0 %v3332_v3  ;;  %v3501_v9 = vsub.f32 %v37_v30, %v86_v41  ;;  %v136_v10 = vand.u32 4294901760, %v135_v56  ;;  %v143_v11 = vand.u32 4294901760, %v142_v57  ;;  %v156_v14 = vsub.f32 %v3452_v44, %v155_v54 }
  0x14   :  { %v176_v15 = vand.u32 4294901760, %v3477_v59  ;;  %v183_v16 = vand.u32 4294901760, %v3480_v60  ;;  %v190_v17 = vand.u32 4294901760, %v3482_v61  ;;  %v197_v19 = vand.u32 4294901760, %v3484_v62 }
  0x15   :  { %v204_v20 = vand.u32 4294901760, %v3486_v63  ;;  %v211_v21 = vand.u32 4294901760, %v3488_v0  ;;  %v218_v23 = vand.u32 4294901760, %v3490_v1  ;;  %v225_v24 = vand.u32 4294901760, %v3492_v2 }
  0x16   :  { %2986 = vmatpush3.bf16.msra.mxu0 %v3455_v45  ;;  %v232_v25 = vand.u32 4294901760, %v3494_v4  ;;  %v239_v26 = vand.u32 4294901760, %v3501_v9  ;;  %v3516_v27 = vpack.c.bf16 %v141_v47, %v134_v46  ;;  %v3518_v28 = vpack.c.bf16 %v155_v54, %v148_v53 }
  0x17   :  { %2987 = vmatprep.subr.bf16.mxu0 %v3332_v3  ;;  %v3520_v29 = vpack.c.bf16 %v169_v7, %v162_v58  ;;  %v3523_v30 = vpack.c.bf16 %v183_v16, %v176_v15  ;;  %v3525_v33 = vpack.c.bf16 %v197_v19, %v190_v17  ;;  %v3527_v36 = vpack.c.bf16 %v211_v21, %v204_v20 }
  0x18   :  { %v3529_v37 = vpack.c.bf16 %v225_v24, %v218_v23  ;;  %v3532_v38 = vpack.c.bf16 %v239_v26, %v232_v25  ;;  %v125_v39 = vand.u32 4294901760, %v124_v5  ;;  %v163_v40 = vsub.f32 %v3459_v48, %v162_v58 }
  0x19   :  { %v3536_v41 = vpack.c.bf16 %v143_v11, %v136_v10  ;;  %v150_v46 = vand.u32 4294901760, %v149_v6  ;;  %v157_v47 = vand.u32 4294901760, %v156_v14  ;;  %v170_v53 = vsub.f32 %v3471_v55, %v169_v7 }
  0x1a   :  { %2989 = vmatpush3.bf16.msra.mxu0 %v3462_v49  ;;  %v177_v54 = vsub.f32 %v3477_v59, %v176_v15  ;;  %v164_v57 = vand.u32 4294901760, %v163_v40  ;;  %v184_v58 = vsub.f32 %v3480_v60, %v183_v16  ;;  %v191_v11 = vsub.f32 %v3482_v61, %v190_v17 }
  0x1b   :  { %2990 = vmatprep.subr.bf16.mxu0 %v3332_v3  ;;  %v3542_v56 = vpack.c.bf16 %v157_v47, %v150_v46  ;;  %v171_v5 = vand.u32 4294901760, %v170_v53  ;;  %v198_v14 = vsub.f32 %v3484_v62, %v197_v19  ;;  %v205_v15 = vsub.f32 %v3486_v63, %v204_v20 }
  0x1c   :  { %v178_v6 = vand.u32 4294901760, %v177_v54  ;;  %v185_v10 = vand.u32 4294901760, %v184_v58  ;;  %v212_v46 = vsub.f32 %v3488_v0, %v211_v21  ;;  %v219_v47 = vsub.f32 %v3490_v1, %v218_v23 }
  0x1d   :  { %v3549_v7 = vpack.c.bf16 %v171_v5, %v164_v57  ;;  %v199_v40 = vand.u32 4294901760, %v198_v14  ;;  %v206_v19 = vand.u32 4294901760, %v205_v15  ;;  %v226_v20 = vsub.f32 %v3492_v2, %v225_v24 }
  0x1e   :  { %2992 = vmatpush3.bf16.msra.mxu0 %v3464_v50  ;;  %v3556_v16 = vpack.c.bf16 %v185_v10, %v178_v6  ;;  %v213_v53 = vand.u32 4294901760, %v212_v46  ;;  %v233_v54 = vsub.f32 %v3494_v4, %v232_v25  ;;  %v220_v21 = vand.u32 4294901760, %v219_v47 }
  0x1f   :  { %2993 = vmatprep.subr.bf16.mxu0 %v3332_v3  ;;  %v227_v5 = vand.u32 4294901760, %v226_v20  ;;  %v240_v23 = vsub.f32 %v3501_v9, %v239_v26  ;;  %v3583_v26 = vpack.c.bf16 %v3443_v35, %v3441_v34  ;;  %v3590_v10 = vpack.c.bf16 %v3452_v44, %v3450_v43 }
  0x20   :  { %v3568_v57 = vpack.c.bf16 %v213_v53, %v206_v19  ;;  %v234_v6 = vand.u32 4294901760, %v233_v54  ;;  %v3598_v34 = vpack.c.bf16 %v3471_v55, %v3459_v48  ;;  %v3604_v35 = vpack.c.bf16 %v3480_v60, %v3477_v59 }
  0x21   :  { %v3573_v58 = vpack.c.bf16 %v227_v5, %v220_v21  ;;  %v241_v24 = vand.u32 4294901760, %v240_v23  ;;  %v3610_v43 = vpack.c.bf16 %v3484_v62, %v3482_v61  ;;  %v3616_v44 = vpack.c.bf16 %v3488_v0, %v3486_v63  ;;  %v2263_v23 = vld [vmem:[%s3871_s4] ss:$0 sm:$0xff] }
  0x22   :  { %2995 = vmatpush3.bf16.msra.mxu0 %v3466_v51  ;;  %v3622_v48 = vpack.c.bf16 %v3492_v2, %v3490_v1  ;;  %v3628_v55 = vpack.c.bf16 %v3501_v9, %v3494_v4  ;;  %vm682_vm1 = vcmask 64512  }
  0x23   :  { %2996 = vmatprep.subr.bf16.mxu0 %v3332_v3  ;;  %v3577_v25 = vpack.c.bf16 %v241_v24, %v234_v6 }
  0x25   :  { %2525 = vmatmul.mubr.f32.vlgmr.msra.gmra.mrb[0].mxu0 %v125_v39  ;;  %v192_v39 = vand.u32 4294901760, %v191_v11 }
  0x26   :  { %2998 = vmatpush3.bf16.msra.mxu0 %v3536_v41  ;;  %2559 = vmatprep.mubr.msk.f32.mxu0 %vm3333_vm0, %v3334_v8 }
  0x27   :  { %2999 = vmatprep.subr.bf16.mxu0 %v3332_v3  ;;  %v3562_v17 = vpack.c.bf16 %v199_v40, %v192_v39 }
  0x2a   :  { %3001 = vmatpush3.bf16.msra.mxu0 %v3542_v56 }
  0x2b   :  { %3002 = vmatprep.subr.bf16.mxu0 %v3332_v3 }
  0x2e   :  { %3004 = vmatpush3.bf16.msra.mxu0 %v3549_v7 }
  0x2f   :  { %3005 = vmatprep.subr.bf16.mxu0 %v3332_v3 }
  0x32   :  { %3007 = vmatpush3.bf16.msra.mxu0 %v3556_v16 }
  0x33   :  { %3008 = vmatprep.subr.bf16.mxu0 %v3332_v3 }
  0x36   :  { %3010 = vmatpush3.bf16.msra.mxu0 %v3562_v17 }
  0x37   :  { %3011 = vmatprep.subr.bf16.mxu0 %v3332_v3 }
  0x3a   :  { %3013 = vmatpush3.bf16.msra.mxu0 %v3568_v57 }
  0x3b   :  { %3014 = vmatprep.subr.bf16.mxu0 %v3332_v3 }
  0x3e   :  { %3016 = vmatpush3.bf16.msra.mxu0 %v3573_v58 }
  0x3f   :  { %3017 = vmatprep.subr.bf16.mxu0 %v3332_v3 }
  0x42   :  { %3019 = vmatpush3.bf16.msra.mxu0 %v3577_v25 }
  0x43   :  { %3020 = vmatprep.subr.bf16.mxu0 %v3332_v3 }
  0x45   :  { %2560 = vmatmul.mubr.f32.vlgmr.msra.gmra.mrb[0].mxu0 %v3436_v31 }
  0x46   :  { %3022 = vmatpush3.bf16.msra.mxu0 %v3583_v26  ;;  %2594 = vmatprep.mubr.msk.f32.mxu0 %vm3333_vm0, %v3334_v8 }
  0x47   :  { %3023 = vmatprep.subr.bf16.mxu0 %v3332_v3 }
  0x4a   :  { %3025 = vmatpush3.bf16.msra.mxu0 %v3590_v10 }
  0x4b   :  { %3026 = vmatprep.subr.bf16.mxu0 %v3332_v3 }
  0x4e   :  { %3028 = vmatpush3.bf16.msra.mxu0 %v3598_v34 }
  0x4f   :  { %3029 = vmatprep.subr.bf16.mxu0 %v3332_v3 }
  0x52   :  { %3031 = vmatpush3.bf16.msra.mxu0 %v3604_v35 }
  0x53   :  { %3032 = vmatprep.subr.bf16.mxu0 %v3332_v3 }
  0x56   :  { %3034 = vmatpush3.bf16.msra.mxu0 %v3610_v43 }
  0x57   :  { %3035 = vmatprep.subr.bf16.mxu0 %v3332_v3 }
  0x5a   :  { %3037 = vmatpush3.bf16.msra.mxu0 %v3616_v44 }
  0x5b   :  { %3038 = vmatprep.subr.bf16.mxu0 %v3332_v3 }
  0x5e   :  { %3040 = vmatpush3.bf16.msra.mxu0 %v3622_v48 }
  0x5f   :  { %3041 = vmatprep.subr.bf16.mxu0 %v3332_v3 }
  0x62   :  { %3043 = vmatpush3.bf16.msra.mxu0 %v3628_v55 }
  0x63   :  { %3044 = vmatprep.subr.bf16.mxu0 %v3332_v3 }
  0x65   :  { %2595 = vmatmul.mubr.f32.vlgmr.msra.gmra.mrb[0].mxu0 %v3448_v42  ;;  %v38_v42 = vld [vmem:[%s3869_s2] sm:$0xff] }
  0x66   :  { %3046 = vmatpush3.bf16.msra.mxu0 %v3390_v12  ;;  %2629 = vmatprep.mubr.msk.f32.mxu0 %vm3333_vm0, %v3334_v8 }
  0x67   :  { %3047 = vmatprep.subr.bf16.mxu0 %v3332_v3 }
  0x6a   :  { %3049 = vmatpush3.bf16.msra.mxu0 %v3393_v13 }
  0x6b   :  { %3050 = vmatprep.subr.bf16.mxu0 %v3332_v3 }
  0x6e   :  { %3052 = vmatpush3.bf16.msra.mxu0 %v3403_v18 }
  0x6f   :  { %3053 = vmatprep.subr.bf16.mxu0 %v3332_v3 }
  0x72   :  { %3055 = vmatpush3.bf16.msra.mxu0 %v3439_v32 }
  0x73   :  { %3056 = vmatprep.subr.bf16.mxu0 %v3332_v3 }
  0x76   :  { %3058 = vmatpush3.bf16.msra.mxu0 %v3455_v45 }
  0x77   :  { %3059 = vmatprep.subr.bf16.mxu0 %v3332_v3 }
  0x7a   :  { %3061 = vmatpush3.bf16.msra.mxu0 %v3462_v49 }
  0x7b   :  { %3062 = vmatprep.subr.bf16.mxu0 %v3332_v3 }
  0x7e   :  { %3064 = vmatpush3.bf16.msra.mxu0 %v3464_v50 }
  0x7f   :  { %3065 = vmatprep.subr.bf16.mxu0 %v3332_v3 }
  0x82   :  { %3067 = vmatpush3.bf16.msra.mxu0 %v3466_v51 }
  0x83   :  { %3068 = vmatprep.subr.bf16.mxu0 %v3332_v3 }
  0x85   :  { %2630 = vmatmul.mubr.f32.vlgmr.msra.gmra.mrb[0].mxu0 %v123_v52  ;;  %v687_v52 = vand.u32 4294901760, %v38_v42 }
  0x86   :  { %3070 = vmatpush3.bf16.msra.mxu0 %v3516_v27  ;;  %2664 = vmatprep.mubr.msk.f32.mxu0 %vm3333_vm0, %v3334_v8 }
  0x87   :  { %3071 = vmatprep.subr.bf16.mxu0 %v3332_v3  ;;  %2703 = vmatpush3.msra.mxu1 %v687_v52  ;;  %v764_v59 = vsub.f32 %v38_v42, %v687_v52 }
  0x88   :  { %2707 = vmatprep.subr.mxu1 %v3334_v8 }
  0x89   :  { %v765_v0 = vand.u32 4294901760, %v764_v59 }
  0x8a   :  { %3073 = vmatpush3.bf16.msra.mxu0 %v3518_v28 }
  0x8b   :  { %3074 = vmatprep.subr.bf16.mxu0 %v3332_v3  ;;  %v766_v2 = vsub.f32 %v764_v59, %v765_v0 }
  0x8d   :  { %v767_v11 = vand.u32 4294901760, %v766_v2 }
  0x8e   :  { %3076 = vmatpush3.bf16.msra.mxu0 %v3520_v29 }
  0x8f   :  { %3077 = vmatprep.subr.bf16.mxu0 %v3332_v3 }
  0x92   :  { %3079 = vmatpush3.bf16.msra.mxu0 %v3523_v30 }
  0x93   :  { %3080 = vmatprep.subr.bf16.mxu0 %v3332_v3 }
  0x96   :  { %3082 = vmatpush3.bf16.msra.mxu0 %v3525_v33 }
  0x97   :  { %3083 = vmatprep.subr.bf16.mxu0 %v3332_v3 }
  0x9a   :  { %3085 = vmatpush3.bf16.msra.mxu0 %v3527_v36 }
  0x9b   :  { %3086 = vmatprep.subr.bf16.mxu0 %v3332_v3 }
  0x9e   :  { %3088 = vmatpush3.bf16.msra.mxu0 %v3529_v37 }
  0x9f   :  { %3089 = vmatprep.subr.bf16.mxu0 %v3332_v3 }
  0xa2   :  { %3091 = vmatpush3.bf16.msra.mxu0 %v3532_v38 }
  0xa3   :  { %3092 = vmatprep.subr.bf16.mxu0 %v3332_v3 }
  0xa5   :  { %2665 = vmatmul.mubr.f32.vlgmr.msra.gmra.mrb[0].mxu0 %v3436_v31 }
  0xa6   :  { %3094 = vmatpush3.bf16.msra.mxu0 %v3390_v12  ;;  %2699 = vmatprep.mubr.msk.f32.mxu0 %vm3333_vm0, %v3334_v8 }
  0xa7   :  { %3095 = vmatprep.subr.bf16.mxu0 %v3332_v3 }
  0xaa   :  { %3097 = vmatpush3.bf16.msra.mxu0 %v3393_v13 }
  0xab   :  { %3098 = vmatprep.subr.bf16.mxu0 %v3332_v3 }
  0xae   :  { %3100 = vmatpush3.bf16.msra.mxu0 %v3403_v18 }
  0xaf   :  { %3101 = vmatprep.subr.bf16.mxu0 %v3332_v3 }
  0xb2   :  { %3103 = vmatpush3.bf16.msra.mxu0 %v3439_v32 }
  0xb3   :  { %3104 = vmatprep.subr.bf16.mxu0 %v3332_v3 }
  0xb6   :  { %3106 = vmatpush3.bf16.msra.mxu0 %v3455_v45 }
  0xb7   :  { %3107 = vmatprep.subr.bf16.mxu0 %v3332_v3 }
  0xba   :  { %3109 = vmatpush3.bf16.msra.mxu0 %v3462_v49 }
  0xbb   :  { %3110 = vmatprep.subr.bf16.mxu0 %v3332_v3 }
  0xbe   :  { %3112 = vmatpush3.bf16.msra.mxu0 %v3464_v50 }
  0xbf   :  { %3113 = vmatprep.subr.bf16.mxu0 %v3332_v3 }
  0xc2   :  { %3115 = vmatpush3.bf16.msra.mxu0 %v3466_v51 }
  0xc3   :  { %2942 = vmatprep.subr.mxu0 %v3334_v8 }
  0xc5   :  { %2700 = vmatmul.mubr.f32.vlgmr.msra.gmra.mrb[0].mxu0 %v3436_v31 }
  0xc6   :  { %2944 = vmatprep.mubr.msk.f32.mxu0 %vm3333_vm0, %v3334_v8 }
 0x198   :  { %v677_v60 = vpop.f32.mrb[0].mxu0 }
 0x199   :  { %v681_v61 = vmul.f32 0.03125, %v677_v60  ;;  %v2701_v62 = vpop.f32.mrb[1].mxu0 }
 0x19b   :  { %v684_v63 = vsel %vm682_vm1, %v681_v61, 0 }
 0x19c   :  { %v752_v31 = vand.u32 4294901760, %v684_v63 }
 0x19e   :  { %v753_v1 = vsub.f32 %v684_v63, %v752_v31 }
 0x1a0   :  { %v754_v4 = vand.u32 4294901760, %v753_v1 }
 0x1a2   :  { %v755_v9 = vsub.f32 %v753_v1, %v754_v4 }
 0x1a4   :  { %v756_v14 = vand.u32 4294901760, %v755_v9 }
 0x1a6   :  { %2705 = vmatmul.mubr.f32.vlgmr.msra.gmra.mrb[0].mxu1 %v756_v14 }
 0x1a7   :  { %2708 = vmatpush3.msra.mxu1 %v767_v11  ;;  %2709 = vmatprep.mubr.msk.f32.mxu1 %vm3333_vm0, %v3334_v8 }
 0x1a8   :  { %2712 = vmatprep.subr.mxu1 %v3334_v8 }
 0x1ae   :  { %2710 = vmatmul.mubr.f32.vlgmr.msra.gmra.mrb[0].mxu1 %v752_v31 }
 0x1af   :  { %2713 = vmatpush3.msra.mxu1 %v764_v59  ;;  %2714 = vmatprep.mubr.msk.f32.mxu1 %vm3333_vm0, %v3334_v8 }
 0x1b0   :  { %2717 = vmatprep.subr.mxu1 %v3334_v8 }
 0x1b6   :  { %2715 = vmatmul.mubr.f32.vlgmr.msra.gmra.mrb[0].mxu1 %v753_v1 }
 0x1b7   :  { %2718 = vmatpush3.msra.mxu1 %v687_v52  ;;  %2719 = vmatprep.mubr.msk.f32.mxu1 %vm3333_vm0, %v3334_v8 }
 0x1b8   :  { %2722 = vmatprep.subr.mxu1 %v3334_v8 }
 0x1be   :  { %2720 = vmatmul.mubr.f32.vlgmr.msra.gmra.mrb[0].mxu1 %v754_v4 }
 0x1bf   :  { %2723 = vmatpush3.msra.mxu1 %v765_v0  ;;  %2724 = vmatprep.mubr.msk.f32.mxu1 %vm3333_vm0, %v3334_v8 }
 0x1c0   :  { %2727 = vmatprep.subr.mxu1 %v3334_v8 }
 0x1c6   :  { %2725 = vmatmul.mubr.f32.vlgmr.msra.gmra.mrb[0].mxu1 %v752_v31 }
 0x1c7   :  { %2728 = vmatpush3.msra.mxu1 %v687_v52  ;;  %2729 = vmatprep.mubr.msk.f32.mxu1 %vm3333_vm0, %v3334_v8 }
 0x1c8   :  { %3116 = vmatprep.subr.bf16.mxu1 %v3332_v3 }
 0x1ce   :  { %2730 = vmatmul.mubr.f32.vlgmr.msra.gmra.mrb[0].mxu1 %v752_v31 }
 0x1cf   :  { %3118 = vmatpush3.bf16.msra.mxu1 %v3390_v12  ;;  %2764 = vmatprep.mubr.msk.f32.mxu1 %vm3333_vm0, %v3334_v8 }
 0x1d0   :  { %3119 = vmatprep.subr.bf16.mxu1 %v3332_v3 }
 0x1d3   :  { %3121 = vmatpush3.bf16.msra.mxu1 %v3393_v13 }
 0x1d4   :  { %3122 = vmatprep.subr.bf16.mxu1 %v3332_v3 }
 0x1d7   :  { %3124 = vmatpush3.bf16.msra.mxu1 %v3403_v18 }
 0x1d8   :  { %3125 = vmatprep.subr.bf16.mxu1 %v3332_v3 }
 0x1db   :  { %3127 = vmatpush3.bf16.msra.mxu1 %v3439_v32 }
 0x1dc   :  { %3128 = vmatprep.subr.bf16.mxu1 %v3332_v3 }
 0x1df   :  { %3130 = vmatpush3.bf16.msra.mxu1 %v3455_v45 }
 0x1e0   :  { %3131 = vmatprep.subr.bf16.mxu1 %v3332_v3 }
 0x1e3   :  { %3133 = vmatpush3.bf16.msra.mxu1 %v3462_v49 }
 0x1e4   :  { %3134 = vmatprep.subr.bf16.mxu1 %v3332_v3 }
 0x1e7   :  { %3136 = vmatpush3.bf16.msra.mxu1 %v3464_v50 }
 0x1e8   :  { %3137 = vmatprep.subr.bf16.mxu1 %v3332_v3 }
 0x1eb   :  { %3139 = vmatpush3.bf16.msra.mxu1 %v3466_v51 }
 0x1ec   :  { %3140 = vmatprep.subr.bf16.mxu1 %v3332_v3 }
 0x2a1   :  { %v1128_v15 = vpop.f32.mrb[0].mxu1 }
 0x2a2   :  { %v3733_v39 = vsub.f32 %v3411_v22, %v1128_v15  ;;  %v2731_v40 = vpop.f32.mrb[1].mxu1 }
 0x2a4   :  { %v1133_v46 = vmul.f32 %v3733_v39, %v3733_v39 }
 0x2a6   :  { %v3737_v47 = vand.u32 4294901760, %v1133_v46 }
 0x2a8   :  { %v1216_v19 = vsub.f32 %v1133_v46, %v3737_v47 }
 0x2aa   :  { %v1217_v53 = vand.u32 4294901760, %v1216_v19 }
 0x2ac   :  { %v1218_v20 = vsub.f32 %v1216_v19, %v1217_v53 }
 0x2ae   :  { %v1219_v54 = vand.u32 4294901760, %v1218_v20 }
 0x2b0   :  { %2765 = vmatmul.mubr.f32.vlgmr.msra.gmra.mrb[2].mxu1 %v1219_v54 }
 0x2b1   :  { %3142 = vmatpush3.bf16.msra.mxu1 %v3536_v41  ;;  %2799 = vmatprep.mubr.msk.f32.mxu1 %vm3333_vm0, %v3334_v8 }
 0x2b2   :  { %3143 = vmatprep.subr.bf16.mxu1 %v3332_v3 }
 0x2b5   :  { %3145 = vmatpush3.bf16.msra.mxu1 %v3542_v56 }
 0x2b6   :  { %3146 = vmatprep.subr.bf16.mxu1 %v3332_v3 }
 0x2b9   :  { %3148 = vmatpush3.bf16.msra.mxu1 %v3549_v7 }
 0x2ba   :  { %3149 = vmatprep.subr.bf16.mxu1 %v3332_v3 }
 0x2bd   :  { %3151 = vmatpush3.bf16.msra.mxu1 %v3556_v16 }
 0x2be   :  { %3152 = vmatprep.subr.bf16.mxu1 %v3332_v3 }
 0x2c1   :  { %3154 = vmatpush3.bf16.msra.mxu1 %v3562_v17 }
 0x2c2   :  { %3155 = vmatprep.subr.bf16.mxu1 %v3332_v3 }
 0x2c5   :  { %3157 = vmatpush3.bf16.msra.mxu1 %v3568_v57 }
 0x2c6   :  { %3158 = vmatprep.subr.bf16.mxu1 %v3332_v3 }
 0x2c9   :  { %3160 = vmatpush3.bf16.msra.mxu1 %v3573_v58 }
 0x2ca   :  { %3161 = vmatprep.subr.bf16.mxu1 %v3332_v3 }
 0x2cd   :  { %3163 = vmatpush3.bf16.msra.mxu1 %v3577_v25 }
 0x2ce   :  { %3164 = vmatprep.subr.bf16.mxu1 %v3332_v3 }
 0x2d0   :  { %2800 = vmatmul.mubr.f32.vlgmr.msra.gmra.mrb[2].mxu1 %v3737_v47 }
 0x2d1   :  { %3166 = vmatpush3.bf16.msra.mxu1 %v3583_v26  ;;  %2834 = vmatprep.mubr.msk.f32.mxu1 %vm3333_vm0, %v3334_v8 }
 0x2d2   :  { %3167 = vmatprep.subr.bf16.mxu1 %v3332_v3 }
 0x2d5   :  { %3169 = vmatpush3.bf16.msra.mxu1 %v3590_v10 }
 0x2d6   :  { %3170 = vmatprep.subr.bf16.mxu1 %v3332_v3 }
 0x2d9   :  { %3172 = vmatpush3.bf16.msra.mxu1 %v3598_v34 }
 0x2da   :  { %3173 = vmatprep.subr.bf16.mxu1 %v3332_v3 }
 0x2dd   :  { %3175 = vmatpush3.bf16.msra.mxu1 %v3604_v35 }
 0x2de   :  { %3176 = vmatprep.subr.bf16.mxu1 %v3332_v3 }
 0x2e1   :  { %3178 = vmatpush3.bf16.msra.mxu1 %v3610_v43 }
 0x2e2   :  { %3179 = vmatprep.subr.bf16.mxu1 %v3332_v3 }
 0x2e5   :  { %3181 = vmatpush3.bf16.msra.mxu1 %v3616_v44 }
 0x2e6   :  { %3182 = vmatprep.subr.bf16.mxu1 %v3332_v3 }
 0x2e9   :  { %3184 = vmatpush3.bf16.msra.mxu1 %v3622_v48 }
 0x2ea   :  { %3185 = vmatprep.subr.bf16.mxu1 %v3332_v3 }
 0x2ed   :  { %3187 = vmatpush3.bf16.msra.mxu1 %v3628_v55 }
 0x2ee   :  { %3188 = vmatprep.subr.bf16.mxu1 %v3332_v3 }
 0x2f0   :  { %2835 = vmatmul.mubr.f32.vlgmr.msra.gmra.mrb[2].mxu1 %v1216_v19 }
 0x2f1   :  { %3190 = vmatpush3.bf16.msra.mxu1 %v3390_v12  ;;  %2869 = vmatprep.mubr.msk.f32.mxu1 %vm3333_vm0, %v3334_v8 }
 0x2f2   :  { %3191 = vmatprep.subr.bf16.mxu1 %v3332_v3 }
 0x2f5   :  { %3193 = vmatpush3.bf16.msra.mxu1 %v3393_v13 }
 0x2f6   :  { %3194 = vmatprep.subr.bf16.mxu1 %v3332_v3 }
 0x2f9   :  { %3196 = vmatpush3.bf16.msra.mxu1 %v3403_v18 }
 0x2fa   :  { %3197 = vmatprep.subr.bf16.mxu1 %v3332_v3 }
 0x2fd   :  { %3199 = vmatpush3.bf16.msra.mxu1 %v3439_v32 }
 0x2fe   :  { %3200 = vmatprep.subr.bf16.mxu1 %v3332_v3 }
 0x301   :  { %3202 = vmatpush3.bf16.msra.mxu1 %v3455_v45 }
 0x302   :  { %3203 = vmatprep.subr.bf16.mxu1 %v3332_v3 }
 0x305   :  { %3205 = vmatpush3.bf16.msra.mxu1 %v3462_v49 }
 0x306   :  { %3206 = vmatprep.subr.bf16.mxu1 %v3332_v3 }
 0x309   :  { %3208 = vmatpush3.bf16.msra.mxu1 %v3464_v50 }
 0x30a   :  { %3209 = vmatprep.subr.bf16.mxu1 %v3332_v3 }
 0x30d   :  { %3211 = vmatpush3.bf16.msra.mxu1 %v3466_v51 }
 0x30e   :  { %3212 = vmatprep.subr.bf16.mxu1 %v3332_v3 }
 0x310   :  { %2870 = vmatmul.mubr.f32.vlgmr.msra.gmra.mrb[2].mxu1 %v1217_v53 }
 0x311   :  { %3214 = vmatpush3.bf16.msra.mxu1 %v3516_v27  ;;  %2904 = vmatprep.mubr.msk.f32.mxu1 %vm3333_vm0, %v3334_v8 }
 0x312   :  { %3215 = vmatprep.subr.bf16.mxu1 %v3332_v3 }
 0x315   :  { %3217 = vmatpush3.bf16.msra.mxu1 %v3518_v28  ;;  %v1776_v28 = vlaneseq }
 0x316   :  { %3218 = vmatprep.subr.bf16.mxu1 %v3332_v3 }
 0x319   :  { %3220 = vmatpush3.bf16.msra.mxu1 %v3520_v29  ;;  %v1777_v29 = vand.u32 127, %v1776_v28 }
 0x31a   :  { %3221 = vmatprep.subr.bf16.mxu1 %v3332_v3 }
 0x31b   :  { %vm1778_vm4 = vcmp.lt.s32.totalorder %v1777_v29, 4 }
 0x31d   :  { %3223 = vmatpush3.bf16.msra.mxu1 %v3523_v30 }
 0x31e   :  { %3224 = vmatprep.subr.bf16.mxu1 %v3332_v3 }
 0x321   :  { %3226 = vmatpush3.bf16.msra.mxu1 %v3525_v33 }
 0x322   :  { %3227 = vmatprep.subr.bf16.mxu1 %v3332_v3 }
 0x325   :  { %3229 = vmatpush3.bf16.msra.mxu1 %v3527_v36 }
 0x326   :  { %3230 = vmatprep.subr.bf16.mxu1 %v3332_v3 }
 0x329   :  { %3232 = vmatpush3.bf16.msra.mxu1 %v3529_v37 }
 0x32a   :  { %3233 = vmatprep.subr.bf16.mxu1 %v3332_v3 }
 0x32d   :  { %3235 = vmatpush3.bf16.msra.mxu1 %v3532_v38 }
 0x32e   :  { %3236 = vmatprep.subr.bf16.mxu1 %v3332_v3 }
 0x330   :  { %2905 = vmatmul.mubr.f32.vlgmr.msra.gmra.mrb[2].mxu1 %v3737_v47 }
 0x331   :  { %3238 = vmatpush3.bf16.msra.mxu1 %v3390_v12  ;;  %2939 = vmatprep.mubr.msk.f32.mxu1 %vm3333_vm0, %v3334_v8  ;;  %v39_v12 = vld [vmem:[%s3870_s3] sm:$0xff] }
 0x332   :  { %3239 = vmatprep.subr.bf16.mxu1 %v3332_v3 }
 0x335   :  { %3241 = vmatpush3.bf16.msra.mxu1 %v3393_v13  ;;  %v1794_v13 = vand.u32 4294901760, %v39_v12 }
 0x336   :  { %3242 = vmatprep.subr.bf16.mxu1 %v3332_v3 }
 0x337   :  { %2943 = vmatpush3.msra.mxu0 %v1794_v13  ;;  %v1871_v30 = vsub.f32 %v39_v12, %v1794_v13 }
 0x338   :  { %2947 = vmatprep.subr.mxu0 %v3334_v8 }
 0x339   :  { %3244 = vmatpush3.bf16.msra.mxu1 %v3403_v18  ;;  %v1872_v38 = vand.u32 4294901760, %v1871_v30 }
 0x33a   :  { %3245 = vmatprep.subr.bf16.mxu1 %v3332_v3 }
 0x33b   :  { %v1873_v7 = vsub.f32 %v1871_v30, %v1872_v38 }
 0x33d   :  { %3247 = vmatpush3.bf16.msra.mxu1 %v3439_v32  ;;  %v1874_v57 = vand.u32 4294901760, %v1873_v7 }
 0x33e   :  { %3248 = vmatprep.subr.bf16.mxu1 %v3332_v3 }
 0x341   :  { %3250 = vmatpush3.bf16.msra.mxu1 %v3455_v45 }
 0x342   :  { %3251 = vmatprep.subr.bf16.mxu1 %v3332_v3 }
 0x345   :  { %3253 = vmatpush3.bf16.msra.mxu1 %v3462_v49 }
 0x346   :  { %3254 = vmatprep.subr.bf16.mxu1 %v3332_v3 }
 0x349   :  { %3256 = vmatpush3.bf16.msra.mxu1 %v3464_v50 }
 0x34a   :  { %3257 = vmatprep.subr.bf16.mxu1 %v3332_v3 }
 0x34d   :  { %3259 = vmatpush3.bf16.msra.mxu1 %v3466_v51 }
 0x350   :  { %2940 = vmatmul.mubr.f32.vlgmr.msra.gmra.mrb[2].mxu1 %v3737_v47 }
 0x423   :  { %v1771_v18 = vpop.f32.mrb[2].mxu1 }
 0x424   :  { %v1775_v22 = vmul.f32 0.032258064, %v1771_v18  ;;  %v2941_v32 = vpop.f32.mrb[3].mxu1 }
 0x426   :  { %3304 = vrsqrt.f32 %v1775_v22  ;;  %vm1781_vm2 = vcmp.eq.f32.partialorder %v1775_v22, inf  ;;  %v1784_v3 = vand.u32 2147483648, %v1775_v22  ;;  %vm1783_vm3 = vcmp.eq.f32.partialorder %v1775_v22, 0.0 }
 0x430   :  { %v3305_v45 = vpop.eup %3304 }
 0x431   :  { %v1780_v49 = vmul.f32 %v3305_v45, %v1775_v22 }
 0x433   :  { %v1782_v50 = vsel %vm1781_vm2, %v1775_v22, %v1780_v49 }
 0x434   :  { %v1785_v51 = vsel %vm1783_vm3, %v1784_v3, %v1782_v50 }
 0x435   :  { %v1786_v27 = vadd.f32 1e-06, %v1785_v51 }
 0x437   :  { %3306 = vrcp.f32 %v1786_v27 }
 0x441   :  { %v3307_v33 = vpop.eup %3306 }
 0x442   :  { %v1789_v36 = vsel %vm1778_vm4, %v3307_v33, 0.0 }
 0x443   :  { %v1791_v37 = vsel %vm682_vm1, %v1789_v36, 0 }
 0x444   :  { %v1859_v41 = vand.u32 4294901760, %v1791_v37 }
 0x446   :  { %v1860_v56 = vsub.f32 %v1791_v37, %v1859_v41 }
 0x448   :  { %v1861_v16 = vand.u32 4294901760, %v1860_v56 }
 0x44a   :  { %v1862_v17 = vsub.f32 %v1860_v56, %v1861_v16 }
 0x44c   :  { %v1863_v21 = vand.u32 4294901760, %v1862_v17 }
 0x44e   :  { %2945 = vmatmul.mubr.f32.vlgmr.msra.gmra.mrb[2].mxu0 %v1863_v21 }
 0x44f   :  { %2948 = vmatpush3.msra.mxu0 %v1874_v57  ;;  %2949 = vmatprep.mubr.msk.f32.mxu0 %vm3333_vm0, %v3334_v8 }
 0x450   :  { %2952 = vmatprep.subr.mxu0 %v3334_v8 }
 0x456   :  { %2950 = vmatmul.mubr.f32.vlgmr.msra.gmra.mrb[2].mxu0 %v1859_v41 }
 0x457   :  { %2953 = vmatpush3.msra.mxu0 %v1871_v30  ;;  %2954 = vmatprep.mubr.msk.f32.mxu0 %vm3333_vm0, %v3334_v8 }
 0x458   :  { %2957 = vmatprep.subr.mxu0 %v3334_v8 }
 0x45e   :  { %2955 = vmatmul.mubr.f32.vlgmr.msra.gmra.mrb[2].mxu0 %v1860_v56 }
 0x45f   :  { %2958 = vmatpush3.msra.mxu0 %v1794_v13  ;;  %2959 = vmatprep.mubr.msk.f32.mxu0 %vm3333_vm0, %v3334_v8 }
 0x460   :  { %2962 = vmatprep.subr.mxu0 %v3334_v8 }
 0x466   :  { %2960 = vmatmul.mubr.f32.vlgmr.msra.gmra.mrb[2].mxu0 %v1861_v16 }
 0x467   :  { %2963 = vmatpush3.msra.mxu0 %v1872_v38  ;;  %2964 = vmatprep.mubr.msk.f32.mxu0 %vm3333_vm0, %v3334_v8 }
 0x468   :  { %2967 = vmatprep.subr.mxu0 %v3334_v8 }
 0x46e   :  { %2965 = vmatmul.mubr.f32.vlgmr.msra.gmra.mrb[2].mxu0 %v1859_v41 }
 0x46f   :  { %2968 = vmatpush3.msra.mxu0 %v1794_v13  ;;  %2969 = vmatprep.mubr.msk.f32.mxu0 %vm3333_vm0, %v3334_v8 }
 0x476   :  { %2970 = vmatmul.mubr.f32.vlgmr.msra.gmra.mrb[2].mxu0 %v1859_v41 }
 0x549   :  { %v2235_v5 = vpop.f32.mrb[2].mxu0 }
 0x54a   :  { %v2239_v58 = vmul.f32 %v2235_v5, %v3733_v39  ;;  %v2971_v6 = vpop.f32.mrb[3].mxu0 }
 0x54c   :  { %v2247_v24 = vadd.f32 %v2263_v23, %v2239_v58 }
 0x54e   :  { %2248 = vst [vmem:[#allocation2] sm:$0xf] %v2247_v24 }
 0x54f   :  { %3319 = shalt.err (!%p3316_p4)
}
 0x550   :  { %s3320_s9 = scalar_lea.hbm %s3872_s5, 64 }
 0x551   :  { %p3321_p5 = scmp.ne.s32.totalorder %s3872_s5, %s3320_s9  ;;  %p3324_p6 = scmp.lt.u32.totalorder %s3320_s9, %s3872_s5 }
 0x553   :  { %p3326_p7 = pnand %p3324_p6, %p3321_p5 }
 0x555   :  { %3329 = shalt.err (!%p3326_p7)
}
 0x556   :  { %2258 = dma.vmem_to_hbm [thread:$0]  %s2256_s30, 64, %s3872_s5, [#allocation3]  }
 0x557   :  { %3330 = dma.done.wait [#allocation3], 64  }
 0x558   :  { %3331 = vsyncadd [#allocation3], 4294967232 }
 0x559   :  { %2262 = vsyncpa [#allocation3], 1 }

</bundles_post_ra>
